<compile_context>
chip_gen: v5e
topology: v5e:2x2
jax: 0.10.0
libtpu: 0.0.40
codegen_flags: <defaults>
</compile_context>

<pallas_src>
import math

import jax
import jax.numpy as jnp
from jax import lax
from jax.experimental import pallas as pl
from jax.experimental.pallas import tpu as pltpu  # noqa: F401  (TPU backend)


def _linear_vpu_kernel(x_ref, wb_ref, o_ref):
    """Small-N path: VPU broadcast-multiplies + XLU cross-lane reductions.

    x_ref:  (B, K)      flattened input
    wb_ref: (N, K + 1)  packed [weight | bias], lane-dense along K
    o_ref:  (B, N)      logits
    """
    k = x_ref.shape[1]
    n = o_ref.shape[1]
    x = x_ref[...].astype(jnp.float32)                        # (B, K)
    cols = []
    for j in range(n):                                        # static unroll (tiny N)
        w_j = wb_ref[j:j + 1, :k].astype(jnp.float32)         # (1, K) lane-dense row
        b_j = wb_ref[j:j + 1, k:k + 1].astype(jnp.float32)    # (1, 1)
        # VPU elementwise multiply, XLU lane reduce; f32 accumulate.
        cols.append(jnp.sum(x * w_j, axis=-1, keepdims=True) + b_j)   # (B, 1)
    o_ref[...] = jnp.concatenate(cols, axis=-1).astype(o_ref.dtype)


def _linear_mxu_kernel(x_ref, wb_ref, o_ref):
    """General path: y = [x | 1] @ [W | b].T (bias folded into the matmul).

    Contracts the shared last axis so the weight stays in its PyTorch (N, K)
    lane-dense layout (transposed-weight push on the MXU, no separate bias
    add and no small-array relayout).
    """
    x = x_ref[...]
    ones = jnp.ones((x.shape[0], 1), dtype=x.dtype)
    x_aug = jnp.concatenate([x, ones], axis=-1)               # (B, K+1)
    acc = lax.dot_general(
        x_aug, wb_ref[...],
        dimension_numbers=(((1,), (1,)), ((), ())),           # contract last axes
        preferred_element_type=jnp.float32,
    )
    o_ref[...] = acc.astype(o_ref.dtype)


def linear_binary_forward(x, weight, bias, *, vpu_max_n=8):
    """LinearBinary.forward: flatten -> linear (x @ W.T + b).

    x:      [B, ...] any trailing shape; flattened to [B, K]
    weight: [N, K]   (PyTorch nn.Linear layout, kept lane-dense)
    bias:   [N]
    returns [B, N]
    """
    B = x.shape[0]
    K = math.prod(x.shape[1:])
    N, Kw = weight.shape
    assert Kw == K, f"weight K={Kw} does not match flattened input K={K}"

    x2 = x.reshape(B, K)                                      # "view" in PyTorch
    # One packed slab -> one weight DMA instead of weight + tiny bias DMA.
    # (In a real model, pack once at parameter load and reuse.)
    wb = jnp.concatenate([weight, bias.reshape(N, 1)], axis=1)  # (N, K+1)

    x_bytes = jnp.dtype(x.dtype).itemsize
    cost = pl.CostEstimate(
        flops=2 * B * K * N,
        transcendentals=0,
        bytes_accessed=int(x_bytes * B * K
                           + jnp.dtype(wb.dtype).itemsize * N * (K + 1)
                           + x_bytes * B * N),
    )

    kernel = _linear_vpu_kernel if N <= vpu_max_n else _linear_mxu_kernel

    out = pl.pallas_call(
        kernel,
        out_shape=jax.ShapeDtypeStruct((B, N), x.dtype),
        # No grid: one invocation, every block is the full array
        # (full-extent blocks satisfy the (8,128) rule).
        in_specs=[
            pl.BlockSpec((B, K), lambda: (0, 0)),             # x, whole array
            pl.BlockSpec((N, K + 1), lambda: (0, 0)),         # [W | b], lane-dense
        ],
        out_specs=pl.BlockSpec((B, N), lambda: (0, 0)),
        cost_estimate=cost,
    )(x2, wb)
    return out


if __name__ == "__main__":
    # task_info: input_shape = (4, 16, 16) -> input_size = 1024
    #            output_dim  = 2           -> binary classification head
    B, C, H, W = 2, 4, 16, 16
    N = 2
    K = C * H * W

    key = jax.random.PRNGKey(0)
    kx, kw, kb = jax.random.split(key, 3)

    x = jax.random.normal(kx, (B, C, H, W), dtype=jnp.float32)
    # nn.Linear default init: U(-1/sqrt(K), 1/sqrt(K)), deterministic here.
    bound = 1.0 / (K ** 0.5)
    weight = jax.random.uniform(kw, (N, K), minval=-bound, maxval=bound,
                                dtype=jnp.float32)
    bias = jax.random.uniform(kb, (N,), minval=-bound, maxval=bound,
                              dtype=jnp.float32)

    y = linear_binary_forward(x, weight, bias)
    y = jax.block_until_ready(y)

    # sanity check against plain-JAX reference
    y_ref = x.reshape(B, K) @ weight.T + bias
    assert y.shape == (B, N)
    assert jnp.allclose(y, y_ref, atol=1e-5, rtol=1e-5)

    print("KERNEL_OK")
</pallas_src>

<mosaic_0001>
module attributes {stable_mosaic.version = 11 : i64} {
  func.func @_linear_vpu_kernel(%arg0: memref<2x1024xf32, #tpu.memory_space<vmem>>, %arg1: memref<2x1025xf32, #tpu.memory_space<vmem>>, %arg2: memref<2x2xf32, #tpu.memory_space<vmem>>) attributes {dimension_semantics = [], scalar_prefetch = 0 : i64, scratch_operands = 0 : i64, tpu.core_type = #tpu.core_type<tc>} {
    %c0 = arith.constant 0 : index
    %c0_0 = arith.constant 0 : index
    %0 = vector.load %arg0[%c0, %c0_0] : memref<2x1024xf32, #tpu.memory_space<vmem>>, vector<2x1024xf32>
    %c0_1 = arith.constant 0 : index
    %c0_2 = arith.constant 0 : index
    %1 = vector.load %arg1[%c0_1, %c0_2] : memref<2x1025xf32, #tpu.memory_space<vmem>>, vector<1x1024xf32>
    %c0_3 = arith.constant 0 : index
    %c1024 = arith.constant 1024 : index
    %2 = vector.load %arg1[%c0_3, %c1024] : memref<2x1025xf32, #tpu.memory_space<vmem>>, vector<1x1xf32>
    %3 = vector.broadcast %1 : vector<1x1024xf32> to vector<2x1024xf32>
    %4 = arith.mulf %0, %3 : vector<2x1024xf32>
    %cst = arith.constant dense<0.000000e+00> : vector<2xf32>
    %5 = vector.multi_reduction <add>, %4, %cst [1] : vector<2x1024xf32> to vector<2xf32>
    %6 = vector.shape_cast %5 : vector<2xf32> to vector<2x1xf32>
    %7 = vector.broadcast %2 : vector<1x1xf32> to vector<2x1xf32>
    %8 = arith.addf %6, %7 : vector<2x1xf32>
    %c1 = arith.constant 1 : index
    %c0_4 = arith.constant 0 : index
    %9 = vector.load %arg1[%c1, %c0_4] : memref<2x1025xf32, #tpu.memory_space<vmem>>, vector<1x1024xf32>
    %c1_5 = arith.constant 1 : index
    %c1024_6 = arith.constant 1024 : index
    %10 = vector.load %arg1[%c1_5, %c1024_6] : memref<2x1025xf32, #tpu.memory_space<vmem>>, vector<1x1xf32>
    %11 = vector.broadcast %9 : vector<1x1024xf32> to vector<2x1024xf32>
    %12 = arith.mulf %0, %11 : vector<2x1024xf32>
    %cst_7 = arith.constant dense<0.000000e+00> : vector<2xf32>
    %13 = vector.multi_reduction <add>, %12, %cst_7 [1] : vector<2x1024xf32> to vector<2xf32>
    %14 = vector.shape_cast %13 : vector<2xf32> to vector<2x1xf32>
    %15 = vector.broadcast %10 : vector<1x1xf32> to vector<2x1xf32>
    %16 = arith.addf %14, %15 : vector<2x1xf32>
    %17 = tpu.concatenate %8, %16 in 1 : vector<2x1xf32>, vector<2x1xf32> -> vector<2x2xf32>
    %c0_8 = arith.constant 0 : index
    %c0_9 = arith.constant 0 : index
    %18 = vector.load %arg2[%c0_8, %c0_9] : memref<2x2xf32, #tpu.memory_space<vmem>>, vector<2x2xf32>
    tpu.vector_store %arg2[%c0_8, %c0_9], %17 {strides = array<i32>} : memref<2x2xf32, #tpu.memory_space<vmem>>, vector<2x2xf32>,
    return
  }
}

</mosaic_0001>

<bundles_post_ra>
// kernel: tpu_custom_call.1
= control target key start
LH: loop header
LB: loop body
LE: loop exit
PB: predicated region body
PF: predicated region fallthrough
CT: control target
= control target key end

     0   :  { %7 = vsyncpa [#allocation3], 0  ;;  %s346_s0 = inlined_call_operand.hbm [shape: f32[2,1024], index: 0, kind: input, shape index: {}]   ;;  %s347_s1 = inlined_call_operand.hbm [shape: f32[2,1025], index: 1, kind: input, shape index: {}]   ;;  %s348_s2 = inlined_call_operand.hbm [shape: f32[2,2], index: 2, kind: output, shape index: {}]  }
   0x1   :  { %8 = vsyncpa [#allocation6], 0 }
   0x2   :  { %9 = vsyncpa [#allocation4], 0  ;;  %s15_s11 = sshll.u32 %s346_s0, 4  ;;  %s290_s12 = smov [#allocation2]   ;;  %s16_s11 = int_to_ptr.hbm [resolvable:$true] %s15_s11 }
   0x3   :  { %s17_s13 = sshll.u32 %s290_s12, 4  ;;  %s26_s16 = sshll.u32 %s347_s1, 4  ;;  %s18_s13 = int_to_ptr.vmem [resolvable:$true] %s17_s13  ;;  %s27_s16 = int_to_ptr.hbm [resolvable:$true] %s26_s16 }
   0x4   :  { %20 = dma.hbm_to_vmem [thread:$0]  %s16_s11, 256, %s18_s13, [#allocation3]  }
   0x5   :  { %s291_s17 = smov [#allocation5]  }
   0x6   :  { %s28_s18 = sshll.u32 %s291_s17, 4  ;;  %s29_s18 = int_to_ptr.vmem [resolvable:$true] %s28_s18 }
   0x7   :  { %31 = dma.hbm_to_vmem [thread:$0]  %s27_s16, 288, %s29_s18, [#allocation6]  }
   0x8   :  { %284 = dma.done.wait [#allocation3], 256  }
   0x9   :  { %285 = vsyncadd [#allocation3], 4294967040 }
   0xa   :  { %286 = dma.done.wait [#allocation6], 288  }
   0xb   :  { %287 = vsyncadd [#allocation6], 4294967008  ;;  %v42_v0 = vld [vmem:[#allocation5] ss:$2 sm:$0xff]  ;;  %vm59_vm0 = vcmask 1041408   ;;  %vm61_vm1 = vcmask 1045508  }
   0xc   :  { %vm63_vm2 = vcmask 1043456   ;;  %v45_v1 = vperm.slane %v42_v0, 0  ;;  %v46_v2 = vperm.slane %v42_v0, 1  ;;  %v47_v3 = vperm.slane %v42_v0, 2  ;;  %v113_v5 = vld [vmem:[#allocation5 + $0x1] ss:$2 sm:$0xff] }
   0xd   :  { %v48_v4 = vperm.slane %v42_v0, 3  ;;  %v49_v6 = vperm.slane %v42_v0, 4  ;;  %v50_v7 = vperm.slane %v42_v0, 5  ;;  %v51_v8 = vperm.slane %v42_v0, 6  ;;  %v40_v14 = vld [vmem:[#allocation2] sm:$0xff]  ;;  %v41_v19 = vld [vmem:[#allocation2 + $0x8] sm:$0xff] }
   0xe   :  { %v52_v9 = vperm.slane %v42_v0, 7  ;;  %v53_v10 = vrot.slane %v46_v2, 6  ;;  %v54_v11 = vrot.slane %v47_v3, 4  ;;  %v116_v13 = vperm.slane %v113_v5, 0  ;;  %s292_s0 = smov 1   ;;  %s293_s1 = smov [#allocation7]  }
   0xf   :  { %v55_v12 = vrot.slane %v48_v4, 2  ;;  %v56_v15 = vrot.slane %v50_v7, 6  ;;  %v57_v16 = vrot.slane %v51_v8, 4  ;;  %v117_v18 = vperm.slane %v113_v5, 1  ;;  %s193_s19 = sshll.u32 %s293_s1, 4  ;;  %s195_s22 = sshll.u32 %s348_s2, 4  ;;  %s194_s19 = int_to_ptr.vmem [resolvable:$true] %s193_s19  ;;  %s196_s22 = int_to_ptr.hbm [resolvable:$true] %s195_s22 }
  0x10   :  { %v58_v17 = vrot.slane %v52_v9, 2  ;;  %v60_v20 = vsel %vm59_vm0, %v45_v1, %v53_v10  ;;  %v118_v22 = vperm.slane %v113_v5, 2  ;;  %v119_v23 = vperm.slane %v113_v5, 3 }
  0x11   :  { %v62_v21 = vsel %vm61_vm1, %v54_v11, %v55_v12  ;;  %v65_v25 = vsel %vm59_vm0, %v49_v6, %v56_v15  ;;  %v120_v27 = vperm.slane %v113_v5, 4  ;;  %v121_v30 = vperm.slane %v113_v5, 5 }
  0x12   :  { %v64_v24 = vsel %vm63_vm2, %v60_v20, %v62_v21  ;;  %v66_v26 = vsel %vm61_vm1, %v57_v16, %v58_v17  ;;  %v122_v31 = vperm.slane %v113_v5, 6  ;;  %v123_v33 = vperm.slane %v113_v5, 7 }
  0x13   :  { %v67_v28 = vsel %vm63_vm2, %v65_v25, %v66_v26  ;;  %v70_v29 = vmul.f32 %v64_v24, %v40_v14  ;;  %v124_v34 = vrot.slane %v117_v18, 6  ;;  %v125_v35 = vrot.slane %v118_v22, 4 }
  0x14   :  { %v71_v32 = vmul.f32 %v67_v28, %v41_v19  ;;  %v126_v36 = vrot.slane %v119_v23, 2  ;;  %v127_v37 = vrot.slane %v121_v30, 6  ;;  %v128_v38 = vrot.slane %v122_v31, 4  ;;  %v210_v30 = vld [vmem:[#allocation5 + $0x11] ss:$0 sm:$0xff] }
  0x15   :  { %74 = vst [vmem:[#allocation1] ss:$4 sm:$0xff] %v70_v29  ;;  %v129_v39 = vrot.slane %v123_v33, 2  ;;  %v130_v40 = vsel %vm59_vm0, %v116_v13, %v124_v34  ;;  %v211_v33 = vld [vmem:[#allocation5 + $0x10] ss:$0 sm:$0xff]  ;;  %vm184_vm3 = vcmask 7168  }
  0x16   :  { %76 = vst [vmem:[#allocation1 + $0x20] ss:$4 sm:$0xff] %v71_v32  ;;  %v131_v41 = vsel %vm61_vm1, %v125_v35, %v126_v36  ;;  %v133_v42 = vsel %vm59_vm0, %v120_v27, %v127_v37  ;;  %vm186_vm4 = vcmask 9216  }
  0x17   :  { %v134_v43 = vsel %vm61_vm1, %v128_v38, %v129_v39  ;;  %v132_v44 = vsel %vm63_vm2, %v130_v40, %v131_v41 }
  0x18   :  { %v135_v45 = vsel %vm63_vm2, %v133_v42, %v134_v43  ;;  %v138_v48 = vmul.f32 %v132_v44, %v40_v14 }
  0x19   :  { %v139_v51 = vmul.f32 %v135_v45, %v41_v19 }
  0x1c   :  { %v77_v46 = vld.sshfl [vmem:[#allocation1] sm:$0xff pattern:$0x73625140]  ;;  %v78_v47 = vld.sshfl [vmem:[#allocation1 + $0x8] sm:$0xff pattern:$0x73625140] }
  0x1d   :  { %v79_v49 = vld.sshfl [vmem:[#allocation1 + $0x10] sm:$0xff pattern:$0x73625140]  ;;  %v80_v50 = vld.sshfl [vmem:[#allocation1 + $0x18] sm:$0xff pattern:$0x73625140] }
  0x1e   :  { %v81_v52 = vld.sshfl [vmem:[#allocation1 + $0x20] sm:$0xff pattern:$0x73625140]  ;;  %v82_v53 = vld.sshfl [vmem:[#allocation1 + $0x28] sm:$0xff pattern:$0x73625140] }
  0x1f   :  { %v83_v54 = vld.sshfl [vmem:[#allocation1 + $0x30] sm:$0xff pattern:$0x73625140]  ;;  %v84_v55 = vld.sshfl [vmem:[#allocation1 + $0x38] sm:$0xff pattern:$0x73625140] }
  0x20   :  { %142 = vst [vmem:[#allocation1] ss:$4 sm:$0xff] %v138_v48  ;;  %v93_v15 = vsel %vm59_vm0, %v77_v46, 0.0  ;;  %v94_v16 = vsel %vm59_vm0, %v78_v47, 0.0  ;;  %v96_v18 = vsel %vm59_vm0, %v79_v49, 0.0  ;;  %v98_v20 = vsel %vm59_vm0, %v80_v50, 0.0 }
  0x21   :  { %144 = vst [vmem:[#allocation1 + $0x20] ss:$4 sm:$0xff] %v139_v51  ;;  %v95_v17 = vadd.f32 %v94_v16, %v93_v15  ;;  %v100_v22 = vsel %vm59_vm0, %v81_v52, 0.0  ;;  %v102_v24 = vsel %vm59_vm0, %v82_v53, 0.0  ;;  %v104_v26 = vsel %vm59_vm0, %v83_v54, 0.0 }
  0x22   :  { %v106_v28 = vsel %vm59_vm0, %v84_v55, 0.0 }
  0x23   :  { %v97_v19 = vadd.f32 %v96_v18, %v95_v17 }
  0x25   :  { %v99_v21 = vadd.f32 %v98_v20, %v97_v19 }
  0x27   :  { %v145_v56 = vld.sshfl [vmem:[#allocation1] sm:$0xff pattern:$0x73625140]  ;;  %v146_v57 = vld.sshfl [vmem:[#allocation1 + $0x8] sm:$0xff pattern:$0x73625140]  ;;  %v101_v23 = vadd.f32 %v100_v22, %v99_v21 }
  0x28   :  { %v147_v58 = vld.sshfl [vmem:[#allocation1 + $0x10] sm:$0xff pattern:$0x73625140]  ;;  %v148_v59 = vld.sshfl [vmem:[#allocation1 + $0x18] sm:$0xff pattern:$0x73625140] }
  0x29   :  { %v161_v60 = vsel %vm59_vm0, %v145_v56, 0.0  ;;  %v162_v61 = vsel %vm59_vm0, %v146_v57, 0.0  ;;  %v164_v62 = vsel %vm59_vm0, %v147_v58, 0.0  ;;  %v149_v63 = vld.sshfl [vmem:[#allocation1 + $0x20] sm:$0xff pattern:$0x73625140]  ;;  %v103_v25 = vadd.f32 %v102_v24, %v101_v23 }
  0x2a   :  { %v163_v0 = vadd.f32 %v162_v61, %v161_v60  ;;  %v166_v1 = vsel %vm59_vm0, %v148_v59, 0.0  ;;  %v150_v2 = vld.sshfl [vmem:[#allocation1 + $0x28] sm:$0xff pattern:$0x73625140]  ;;  %v168_v4 = vsel %vm59_vm0, %v149_v63, 0.0 }
  0x2b   :  { %v151_v5 = vld.sshfl [vmem:[#allocation1 + $0x30] sm:$0xff pattern:$0x73625140]  ;;  %v170_v7 = vsel %vm59_vm0, %v150_v2, 0.0  ;;  %v105_v27 = vadd.f32 %v104_v26, %v103_v25 }
  0x2c   :  { %v165_v3 = vadd.f32 %v164_v62, %v163_v0  ;;  %v152_v8 = vld.sshfl [vmem:[#allocation1 + $0x38] sm:$0xff pattern:$0x73625140]  ;;  %v172_v10 = vsel %vm59_vm0, %v151_v5, 0.0 }
  0x2d   :  { %v174_v12 = vsel %vm59_vm0, %v152_v8, 0.0  ;;  %v107_v29 = vadd.f32 %v106_v28, %v105_v27 }
  0x2e   :  { %v167_v6 = vadd.f32 %v166_v1, %v165_v3 }
  0x30   :  { %v169_v9 = vadd.f32 %v168_v4, %v167_v6 }
  0x32   :  { %v171_v11 = vadd.f32 %v170_v7, %v169_v9 }
  0x34   :  { %v173_v13 = vadd.f32 %v172_v10, %v171_v11 }
  0x36   :  { %v175_v14 = vadd.f32 %v174_v12, %v173_v13 }
  0x38   :  { %176 = vadd.xlane.f32.xlu0 %v175_v14 }
  0x40   :  { %108 = vadd.xlane.f32.xlu0 %v107_v29 }
  0xab   :  { %v177_v31 = vpop.xlane.xlu0 %176 }
  0xac   :  { %v179_v32 = vadd.f32 %v210_v30, %v177_v31 }
  0xae   :  { %181 = vrot.lane.b32.xlu1 %v179_v32, %s292_s0 }
  0xb3   :  { %v109_v34 = vpop.xlane.xlu0 %108 }
  0xb4   :  { %v111_v35 = vadd.f32 %v211_v33, %v109_v34 }
 0x120   :  { %v182_v36 = vpop.permute.xlu1 %181 }
 0x121   :  { %v185_v37 = vsel %vm184_vm3, %v111_v35, %v182_v36 }
 0x122   :  { %187 = vst.msk [vmem:[#allocation7] sm:$0x3] %vm186_vm4, %v185_v37 }
 0x123   :  { %198 = dma.vmem_to_hbm [thread:$0]  %s194_s19, 32, %s196_s22, [#allocation4]  }
 0x124   :  { %288 = dma.done.wait [#allocation4], 32  }
 0x125   :  { %289 = vsyncadd [#allocation4], 4294967264 }
 0x126   :  { %203 = vsyncpa [#allocation3], 1 }
 0x127   :  { %204 = vsyncpa [#allocation6], 1 }
 0x128   :  { %205 = vsyncpa [#allocation4], 1 }

</bundles_post_ra>
